<compile_context>
chip_gen: v6e
topology: v6e:2x2x1
jax: 0.10.0
libtpu: 0.0.40
codegen_flags: <defaults>
</compile_context>

<pallas_src>
import jax
import jax.numpy as jnp
from jax import lax
from jax.experimental import pallas as pl
from jax.experimental.pallas import tpu as pltpu

EPS = 1e-5


# -----------------------------------------------------------------------------
# Kernel 1: single-pass — full (C, L) slab per batch resident in VMEM.
# -----------------------------------------------------------------------------
def elain_kernel(x_ref, add_ref, w_gba_ref, w_wx_ref, b3_ref, out_ref):
    nb, _, l = x_ref.shape

    # Weights / biases hoisted out of the per-batch loop (constant blocks).
    # Leading-dim indexing -> no sublane slicing, works for any C.
    w_g = w_gba_ref[0]        # (C, C_add) = Wgamma @ Wsame
    w_b = w_gba_ref[1]        # (C, C_add) = Wbeta  @ Wsame
    w_w1 = w_gba_ref[2]       # (C, C_add) = Wweight[:, :C] @ Wsame
    w_wx = w_wx_ref[...]      # (C, C)     = Wweight[:, C:]
    b_g = b3_ref[0]           # (C, 1) fused biases (f32)
    b_b = b3_ref[1]
    b_w = b3_ref[2]

    inv_l = 1.0 / l
    inv_lm1 = 1.0 / max(l - 1, 1)     # torch.var default: unbiased

    def per_batch(b, carry):
        x32 = x_ref[b].astype(jnp.float32)   # in-vreg cast; HBM stream stays native
        addition = add_ref[b]                # native dtype straight into the MXU
        a32 = addition.astype(jnp.float32)

        # Per-channel stats (lane reductions).
        x_avg = jnp.sum(x32, axis=1, keepdims=True) * inv_l          # (C, 1)
        diff = x32 - x_avg
        x_var = jnp.sum(diff * diff, axis=1, keepdims=True) * inv_lm1
        inv_std = lax.rsqrt(x_var + EPS)                             # (C, 1) EUP
        x_std = (x_var + EPS) * inv_std                              # sqrt(var+eps)
        add_avg = jnp.sum(a32, axis=1, keepdims=True) * inv_l        # (C_add, 1)

        # Element-adaptive blend weight: two small matvecs, no concat/relayout.
        weight = (jnp.dot(w_w1, add_avg, preferred_element_type=jnp.float32)
                  + jnp.dot(w_wx, x_avg, preferred_element_type=jnp.float32)
                  + b_w)                                             # (C, 1)

        # Fold biases, (1 - weight) terms and the "+1" into per-channel consts:
        #   out = diff * (gb_g*(w*inv_std) + k1*inv_std) + gb_b*w + k2
        one_m_w = 1.0 - weight
        k1 = b_g * weight + x_std * one_m_w + 1.0
        k2 = b_b * weight + x_avg * one_m_w
        wg_s = weight * inv_std
        k1_s = k1 * inv_std

        # Bias-free 1x1-conv matmuls on the MXU (biases folded into k1/k2).
        gb_g = jnp.dot(w_g, addition, preferred_element_type=jnp.float32)  # (C, L)
        gb_b = jnp.dot(w_b, addition, preferred_element_type=jnp.float32)  # (C, L)

        out_ref[b] = (diff * (gb_g * wg_s + k1_s)
                      + (gb_b * weight + k2)).astype(out_ref.dtype)
        return carry

    # fori_loop bounds per-batch liveness (vs. a Python-level static unroll).
    lax.fori_loop(0, nb, per_batch, 0, unroll=True)


# -----------------------------------------------------------------------------
# Kernel 2: L-tiled two-pass — stats pass then apply pass, per batch (nb = 1).
# Used when one (C, L) slab per batch would not fit the VMEM budget.
# -----------------------------------------------------------------------------
def elain_kernel_ltiled(x_ref, add_ref, w_gba_ref, w_wx_ref, b3_ref, out_ref,
                        acc_ref, acc_add_ref, st_ref):
    p = pl.program_id(1)          # 0 = stats pass, 1 = apply pass
    lt = pl.program_id(2)
    n_lt = pl.num_programs(2)
    _, _, tl = x_ref.shape
    l_total = n_lt * tl
    inv_l = 1.0 / l_total
    inv_lm1 = 1.0 / max(l_total - 1, 1)

    @pl.when(p == 0)
    def _stats_pass():
        @pl.when(lt == 0)
        def _():
            acc_ref[...] = jnp.zeros_like(acc_ref)
            acc_add_ref[...] = jnp.zeros_like(acc_add_ref)

        x32 = x_ref[0].astype(jnp.float32)
        a32 = add_ref[0].astype(jnp.float32)
        acc_ref[0] += jnp.sum(x32, axis=1, keepdims=True)
        acc_ref[1] += jnp.sum(x32 * x32, axis=1, keepdims=True)
        acc_add_ref[...] += jnp.sum(a32, axis=1, keepdims=True)

        @pl.when(lt == n_lt - 1)
        def _finalize():
            x_sum = acc_ref[0]
            x_avg = x_sum * inv_l
            x_var = jnp.maximum((acc_ref[1] - x_sum * x_avg) * inv_lm1, 0.0)
            inv_std = lax.rsqrt(x_var + EPS)
            x_std = (x_var + EPS) * inv_std
            add_avg = acc_add_ref[...] * inv_l
            b_g = b3_ref[0]
            b_b = b3_ref[1]
            b_w = b3_ref[2]
            weight = (jnp.dot(w_gba_ref[2], add_avg,
                              preferred_element_type=jnp.float32)
                      + jnp.dot(w_wx_ref[...], x_avg,
                                preferred_element_type=jnp.float32)
                      + b_w)
            one_m_w = 1.0 - weight
            k1 = b_g * weight + x_std * one_m_w + 1.0
            k2 = b_b * weight + x_avg * one_m_w
            st_ref[0] = x_avg
            st_ref[1] = weight * inv_std        # wg_s
            st_ref[2] = k1 * inv_std            # k1_s
            st_ref[3] = weight
            st_ref[4] = k2

    @pl.when(p == 1)
    def _apply_pass():
        addition = add_ref[0]
        x32 = x_ref[0].astype(jnp.float32)
        gb_g = jnp.dot(w_gba_ref[0], addition, preferred_element_type=jnp.float32)
        gb_b = jnp.dot(w_gba_ref[1], addition, preferred_element_type=jnp.float32)
        diff = x32 - st_ref[0]
        out_ref[0] = (diff * (gb_g * st_ref[1] + st_ref[2])
                      + (gb_b * st_ref[3] + st_ref[4])).astype(out_ref.dtype)


# -----------------------------------------------------------------------------
# Host-side helpers
# -----------------------------------------------------------------------------
def prepare_params(params, norm_nc, compute_dtype=None):
    """One-time fold of mlp_same into the gamma/beta/weight paths (in f32).

    Returns (w_gba, w_wx, b3):
      w_gba: (3, C, C_add) = [Wg@Ws, Wb@Ws, Ww1@Ws]   (compute dtype)
      w_wx : (C, C)        = Ww2                       (compute dtype)
      b3   : (3, C, 1)     = [Wg@bs+bg, Wb@bs+bb, Ww1@bs+bw]  (f32)
    Pass compute_dtype=jnp.bfloat16 to stream/matmul in bf16.
    """
    (w_same, b_same, w_gamma, b_gamma,
     w_beta, b_beta, w_weight, b_weight) = [jnp.asarray(p, jnp.float32)
                                            for p in params]
    c = norm_nc
    w_g = w_gamma @ w_same
    w_b = w_beta @ w_same
    w_w1 = w_weight[:, :c] @ w_same
    w_wx = w_weight[:, c:]
    b_g = w_gamma @ b_same + b_gamma
    b_b = w_beta @ b_same + b_beta
    b_w = w_weight[:, :c] @ b_same + b_weight
    mm_dtype = jnp.float32 if compute_dtype is None else compute_dtype
    w_gba = jnp.stack([w_g, w_b, w_w1], axis=0).astype(mm_dtype)
    b3 = jnp.stack([b_g, b_b, b_w], axis=0)      # biases stay f32 (epilogue math)
    return w_gba, jnp.asarray(w_wx, mm_dtype), b3


def _vmem_info():
    """Generation-aware VMEM budget (v5e/v6e: 128 MiB, v7x: 64 MiB per TC)."""
    phys = 64 * 1024 * 1024            # conservative default: v7x per-TensorCore
    try:
        info = pltpu.get_tpu_info()
        for attr in ("vmem_capacity_bytes", "vmem_size_bytes", "vmem_bytes"):
            v = getattr(info, attr, None)
            if v:
                phys = int(v)
                break
    except Exception:
        pass
    limit = int(phys * 0.85)           # headroom for compiler scratch / spill
    # <=64 MiB per-core VMEM -> v7x-like chip with 2 TensorCores sharing the
    # chip; keep the parallel grid extent >= 2 there so both cores get work.
    multi_tc = phys <= 72 * 1024 * 1024
    return limit, multi_tc


def _weight_bytes(fused):
    # Double-buffered weight copies (default pipelining).
    return 2 * sum(int(w.size) * w.dtype.itemsize for w in fused)


def _pick_batch_tile(n, c, c_add, l, x_isz, a_isz, o_isz, w_bytes, budget, multi_tc):
    io_per_batch = 2 * (c * x_isz + c_add * a_isz + c * o_isz) * l  # dbl-buffered I/O
    live = (5 * c + c_add) * l * 4     # f32 intermediates of ONE in-flight batch
    best = 0
    for nb in range(1, n + 1):
        if n % nb:
            continue
        if nb * io_per_batch + live + w_bytes > budget:
            continue
        if multi_tc and n >= 2 and n // nb < 2:
            continue                    # keep >= 2 parallel steps for the 2nd TC
        best = nb
    return best


def _pick_l_tile(c, c_add, l, x_isz, a_isz, o_isz, w_bytes, budget):
    best = 0
    for tl in range(128, l + 1, 128):
        if l % tl:
            continue
        need = (2 * (c * x_isz + c_add * a_isz + c * o_isz) * tl
                + (3 * c + c_add) * tl * 4
                + w_bytes + (10 * c + c_add) * 4)
        if need <= budget:
            best = tl
    return best


def elain_forward(x, addition, fused, *, force_l_tiled=False, l_tile=None):
    n, c, l = x.shape
    n_a, c_add, l_a = addition.shape
    assert n_a == n and l_a == l, "addition must match x in batch and length"
    assert l % 128 == 0, "pad L to a multiple of 128 for lane-dense stores"

    w_gba, w_wx, b3 = fused
    assert w_gba.shape == (3, c, c_add)
    assert w_wx.shape == (c, c) and b3.shape == (3, c, 1)

    budget, multi_tc = _vmem_info()
    w_bytes = _weight_bytes(fused)
    x_isz = x.dtype.itemsize
    a_isz = addition.dtype.itemsize
    o_isz = x.dtype.itemsize

    weight_specs = [
        pl.BlockSpec((3, c, c_add), lambda *idx: (0, 0, 0)),
        pl.BlockSpec((c, c), lambda *idx: (0, 0)),
        pl.BlockSpec((3, c, 1), lambda *idx: (0, 0, 0)),
    ]

    nb = 0 if force_l_tiled else _pick_batch_tile(
        n, c, c_add, l, x_isz, a_isz, o_isz, w_bytes, budget, multi_tc)

    if nb:
        # ---------------- single-pass path ----------------
        return pl.pallas_call(
            elain_kernel,
            out_shape=jax.ShapeDtypeStruct((n, c, l), x.dtype),
            grid=(n // nb,),
            in_specs=[
                pl.BlockSpec((nb, c, l), lambda i: (i, 0, 0)),
                pl.BlockSpec((nb, c_add, l), lambda i: (i, 0, 0)),
            ] + weight_specs,
            out_specs=pl.BlockSpec((nb, c, l), lambda i: (i, 0, 0)),
            compiler_params=pltpu.CompilerParams(
                dimension_semantics=("parallel",),
                vmem_limit_bytes=budget,
            ),
        )(x, addition, w_gba, w_wx, b3)

    # ---------------- L-tiled two-pass path ----------------
    tl = l_tile if (force_l_tiled and l_tile) else _pick_l_tile(
        c, c_add, l, x_isz, a_isz, o_isz, w_bytes, budget)
    if not tl:
        raise ValueError("ElaIN: shape too large for L-tiled path; "
                         "C-tiling not implemented")  # TODO(synk)
    assert l % tl == 0 and tl % 128 == 0

    return pl.pallas_call(
        elain_kernel_ltiled,
        out_shape=jax.ShapeDtypeStruct((n, c, l), x.dtype),
        grid=(n, 2, l // tl),
        in_specs=[
            pl.BlockSpec((1, c, tl), lambda b, p, t: (b, 0, t)),
            pl.BlockSpec((1, c_add, tl), lambda b, p, t: (b, 0, t)),
        ] + weight_specs,
        # p==0 (stats): park the out block at tile 0 (it is only flushed after
        # pass 1 writes it); p==1 (apply): walk the L tiles.
        out_specs=pl.BlockSpec((1, c, tl), lambda b, p, t: (b, 0, t * p)),
        scratch_shapes=[
            pltpu.VMEM((2, c, 1), jnp.float32),     # sum(x), sum(x^2)
            pltpu.VMEM((c_add, 1), jnp.float32),    # sum(addition)
            pltpu.VMEM((5, c, 1), jnp.float32),     # x_avg, wg_s, k1_s, w, k2
        ],
        compiler_params=pltpu.CompilerParams(
            dimension_semantics=("parallel", "arbitrary", "arbitrary"),
            vmem_limit_bytes=budget,
        ),
    )(x, addition, w_gba, w_wx, b3)


# -----------------------------------------------------------------------------
# Pure-JAX reference (un-fused, matches the PyTorch forward) and param init
# -----------------------------------------------------------------------------
def elain_reference(x, addition, params):
    (w_same, b_same, w_gamma, b_gamma,
     w_beta, b_beta, w_weight, b_weight) = params
    conv1x1 = lambda w, b, t: jnp.einsum('oc,ncl->nol', w, t) + b[None]
    add = conv1x1(w_same, b_same, addition)
    add_gamma = conv1x1(w_gamma, b_gamma, add)
    add_beta = conv1x1(w_beta, b_beta, add)
    id_avg = jnp.mean(add, axis=2, keepdims=True)
    x_avg = jnp.mean(x, axis=2, keepdims=True)
    weight_cat = jnp.concatenate([id_avg, x_avg], axis=1)
    weight = conv1x1(w_weight, b_weight, weight_cat)
    L = x.shape[2]
    x_var = jnp.sum((x - x_avg) ** 2, axis=2, keepdims=True) / (L - 1)
    x_std = jnp.sqrt(x_var + EPS)
    gamma = add_gamma * weight + x_std * (1.0 - weight)
    beta = add_beta * weight + x_avg * (1.0 - weight)
    x_n = (x - x_avg) / x_std
    return x_n * (1.0 + gamma) + beta


def init_params(key, norm_nc, addition_nc):
    ks = jax.random.split(key, 8)
    mk_w = lambda k, o, i: (0.1 * jax.random.normal(k, (o, i))).astype(jnp.float32)
    mk_b = lambda k, o: (0.1 * jax.random.normal(k, (o, 1))).astype(jnp.float32)
    return (
        mk_w(ks[0], norm_nc, addition_nc), mk_b(ks[1], norm_nc),   # mlp_same
        mk_w(ks[2], norm_nc, norm_nc),     mk_b(ks[3], norm_nc),   # mlp_gamma
        mk_w(ks[4], norm_nc, norm_nc),     mk_b(ks[5], norm_nc),   # mlp_beta
        mk_w(ks[6], norm_nc, 2 * norm_nc), mk_b(ks[7], norm_nc),   # mlp_weight
    )


if __name__ == "__main__":
    N, norm_nc, addition_nc, L = 2, 8, 16, 128

    key = jax.random.PRNGKey(0)
    kx, ka, kp = jax.random.split(key, 3)
    x = jax.random.normal(kx, (N, norm_nc, L), dtype=jnp.float32)
    addition = jax.random.normal(ka, (N, addition_nc, L), dtype=jnp.float32)
    params = init_params(kp, norm_nc, addition_nc)

    # One-time (outside the hot path): fold mlp_same into gamma/beta/weight.
    fused = prepare_params(params, norm_nc)

    fwd = jax.jit(elain_forward)
    out = jax.block_until_ready(fwd(x, addition, fused))
    ref = elain_reference(x, addition, params)
    assert out.shape == (N, norm_nc, L)
    assert jnp.allclose(out, ref, rtol=1e-4, atol=1e-4), "single-pass mismatch"

    # Also exercise the L-tiled two-pass path (auto-selected when a full (C, L)
    # slab per batch would not fit the per-core VMEM budget, e.g. v7x / large L).
    L2 = 256
    x2 = jax.random.normal(kx, (N, norm_nc, L2), dtype=jnp.float32)
    a2 = jax.random.normal(ka, (N, addition_nc, L2), dtype=jnp.float32)
    out2 = jax.block_until_ready(
        elain_forward(x2, a2, fused, force_l_tiled=True, l_tile=128))
    ref2 = elain_reference(x2, a2, params)
    assert jnp.allclose(out2, ref2, rtol=1e-4, atol=1e-4), "L-tiled mismatch"

    print("KERNEL_OK")
</pallas_src>

<mosaic_0001>
module attributes {stable_mosaic.version = 11 : i64} {
  func.func @elain_kernel(%arg0: i32, %arg1: memref<1x8x128xf32, #tpu.memory_space<vmem>>, %arg2: memref<1x16x128xf32, #tpu.memory_space<vmem>>, %arg3: memref<3x8x16xf32, #tpu.memory_space<vmem>>, %arg4: memref<8x8xf32, #tpu.memory_space<vmem>>, %arg5: memref<3x8x1xf32, #tpu.memory_space<vmem>>, %arg6: memref<1x8x128xf32, #tpu.memory_space<vmem>>) attributes {dimension_semantics = [#tpu.dimension_semantics<parallel>], iteration_bounds = array<i64: 2>, scalar_prefetch = 0 : i64, scratch_operands = 0 : i64, tpu.core_type = #tpu.core_type<tc>, window_params = [{transform_indices = @transform_0, window_bounds = array<i64: 1, 8, 128>}, {transform_indices = @transform_1, window_bounds = array<i64: 1, 16, 128>}, {pipeline_mode = #tpu.pipeline_mode<synchronous>, transform_indices = @transform_2, window_bounds = array<i64: 3, 8, 16>}, {pipeline_mode = #tpu.pipeline_mode<synchronous>, transform_indices = @transform_3, window_bounds = array<i64: 8, 8>}, {pipeline_mode = #tpu.pipeline_mode<synchronous>, transform_indices = @transform_4, window_bounds = array<i64: 3, 8, 1>}, {transform_indices = @transform_5, window_bounds = array<i64: 1, 8, 128>}]} {
    %c0 = arith.constant 0 : index
    %c0_0 = arith.constant 0 : index
    %c0_1 = arith.constant 0 : index
    %0 = vector.load %arg3[%c0, %c0_0, %c0_1] : memref<3x8x16xf32, #tpu.memory_space<vmem>>, vector<1x8x16xf32>
    %1 = vector.shape_cast %0 : vector<1x8x16xf32> to vector<8x16xf32>
    %c1 = arith.constant 1 : index
    %c0_2 = arith.constant 0 : index
    %c0_3 = arith.constant 0 : index
    %2 = vector.load %arg3[%c1, %c0_2, %c0_3] : memref<3x8x16xf32, #tpu.memory_space<vmem>>, vector<1x8x16xf32>
    %3 = vector.shape_cast %2 : vector<1x8x16xf32> to vector<8x16xf32>
    %c2 = arith.constant 2 : index
    %c0_4 = arith.constant 0 : index
    %c0_5 = arith.constant 0 : index
    %4 = vector.load %arg3[%c2, %c0_4, %c0_5] : memref<3x8x16xf32, #tpu.memory_space<vmem>>, vector<1x8x16xf32>
    %5 = vector.shape_cast %4 : vector<1x8x16xf32> to vector<8x16xf32>
    %c0_6 = arith.constant 0 : index
    %c0_7 = arith.constant 0 : index
    %6 = vector.load %arg4[%c0_6, %c0_7] : memref<8x8xf32, #tpu.memory_space<vmem>>, vector<8x8xf32>
    %c0_8 = arith.constant 0 : index
    %c0_9 = arith.constant 0 : index
    %c0_10 = arith.constant 0 : index
    %7 = vector.load %arg5[%c0_8, %c0_9, %c0_10] : memref<3x8x1xf32, #tpu.memory_space<vmem>>, vector<1x8x1xf32>
    %8 = vector.shape_cast %7 : vector<1x8x1xf32> to vector<8x1xf32>
    %c1_11 = arith.constant 1 : index
    %c0_12 = arith.constant 0 : index
    %c0_13 = arith.constant 0 : index
    %9 = vector.load %arg5[%c1_11, %c0_12, %c0_13] : memref<3x8x1xf32, #tpu.memory_space<vmem>>, vector<1x8x1xf32>
    %10 = vector.shape_cast %9 : vector<1x8x1xf32> to vector<8x1xf32>
    %c2_14 = arith.constant 2 : index
    %c0_15 = arith.constant 0 : index
    %c0_16 = arith.constant 0 : index
    %11 = vector.load %arg5[%c2_14, %c0_15, %c0_16] : memref<3x8x1xf32, #tpu.memory_space<vmem>>, vector<1x8x1xf32>
    %12 = vector.shape_cast %11 : vector<1x8x1xf32> to vector<8x1xf32>
    %c0_i32 = arith.constant 0 : i32
    %13 = arith.index_cast %c0_i32 : i32 to index
    %c0_17 = arith.constant 0 : index
    %c0_18 = arith.constant 0 : index
    %14 = vector.load %arg1[%13, %c0_17, %c0_18] : memref<1x8x128xf32, #tpu.memory_space<vmem>>, vector<1x8x128xf32>
    %15 = vector.shape_cast %14 : vector<1x8x128xf32> to vector<8x128xf32>
    %16 = arith.index_cast %c0_i32 : i32 to index
    %c0_19 = arith.constant 0 : index
    %c0_20 = arith.constant 0 : index
    %17 = vector.load %arg2[%16, %c0_19, %c0_20] : memref<1x16x128xf32, #tpu.memory_space<vmem>>, vector<1x16x128xf32>
    %18 = vector.shape_cast %17 : vector<1x16x128xf32> to vector<16x128xf32>
    %cst = arith.constant dense<0.000000e+00> : vector<8xf32>
    %19 = vector.multi_reduction <add>, %15, %cst [1] : vector<8x128xf32> to vector<8xf32>
    %20 = vector.shape_cast %19 : vector<8xf32> to vector<8x1xf32>
    %cst_21 = arith.constant 7.812500e-03 : f32
    %21 = vector.broadcast %cst_21 : f32 to vector<8x1xf32>
    %22 = arith.mulf %20, %21 : vector<8x1xf32>
    %23 = vector.broadcast %22 : vector<8x1xf32> to vector<8x128xf32>
    %24 = arith.subf %15, %23 : vector<8x128xf32>
    %25 = arith.mulf %24, %24 : vector<8x128xf32>
    %cst_22 = arith.constant dense<0.000000e+00> : vector<8xf32>
    %26 = vector.multi_reduction <add>, %25, %cst_22 [1] : vector<8x128xf32> to vector<8xf32>
    %27 = vector.shape_cast %26 : vector<8xf32> to vector<8x1xf32>
    %cst_23 = arith.constant 0.00787401571 : f32
    %28 = vector.broadcast %cst_23 : f32 to vector<8x1xf32>
    %29 = arith.mulf %27, %28 : vector<8x1xf32>
    %cst_24 = arith.constant 9.99999974E-6 : f32
    %30 = vector.broadcast %cst_24 : f32 to vector<8x1xf32>
    %31 = arith.addf %29, %30 : vector<8x1xf32>
    %32 = math.rsqrt %31 : vector<8x1xf32>
    %cst_25 = arith.constant 9.99999974E-6 : f32
    %33 = vector.broadcast %cst_25 : f32 to vector<8x1xf32>
    %34 = arith.addf %29, %33 : vector<8x1xf32>
    %35 = arith.mulf %34, %32 : vector<8x1xf32>
    %cst_26 = arith.constant dense<0.000000e+00> : vector<16xf32>
    %36 = vector.multi_reduction <add>, %18, %cst_26 [1] : vector<16x128xf32> to vector<16xf32>
    %37 = vector.shape_cast %36 : vector<16xf32> to vector<16x1xf32>
    %cst_27 = arith.constant 7.812500e-03 : f32
    %38 = vector.broadcast %cst_27 : f32 to vector<16x1xf32>
    %39 = arith.mulf %37, %38 : vector<16x1xf32>
    %cst_28 = arith.constant dense<0.000000e+00> : vector<8x1xf32>
    %40 = tpu.matmul %5, %39, %cst_28 {dimension_numbers = #tpu.dot_dimension_numbers<[1], [0], [0], [1], [0, 0, 1, 1], [], []>} : vector<8x16xf32>, vector<16x1xf32>, vector<8x1xf32> -> vector<8x1xf32>
    %cst_29 = arith.constant dense<0.000000e+00> : vector<8x1xf32>
    %41 = tpu.matmul %6, %22, %cst_29 {dimension_numbers = #tpu.dot_dimension_numbers<[1], [0], [0], [1], [0, 0, 1, 1], [], []>} : vector<8x8xf32>, vector<8x1xf32>, vector<8x1xf32> -> vector<8x1xf32>
    %42 = arith.addf %40, %41 : vector<8x1xf32>
    %43 = arith.addf %42, %12 : vector<8x1xf32>
    %cst_30 = arith.constant 1.000000e+00 : f32
    %44 = vector.broadcast %cst_30 : f32 to vector<8x1xf32>
    %45 = arith.subf %44, %43 : vector<8x1xf32>
    %46 = arith.mulf %8, %43 : vector<8x1xf32>
    %47 = arith.mulf %35, %45 : vector<8x1xf32>
    %48 = arith.addf %46, %47 : vector<8x1xf32>
    %cst_31 = arith.constant 1.000000e+00 : f32
    %49 = vector.broadcast %cst_31 : f32 to vector<8x1xf32>
    %50 = arith.addf %48, %49 : vector<8x1xf32>
    %51 = arith.mulf %10, %43 : vector<8x1xf32>
    %52 = arith.mulf %22, %45 : vector<8x1xf32>
    %53 = arith.addf %51, %52 : vector<8x1xf32>
    %54 = arith.mulf %43, %32 : vector<8x1xf32>
    %55 = arith.mulf %50, %32 : vector<8x1xf32>
    %cst_32 = arith.constant dense<0.000000e+00> : vector<8x128xf32>
    %56 = tpu.matmul %1, %18, %cst_32 {dimension_numbers = #tpu.dot_dimension_numbers<[1], [0], [0], [1], [0, 0, 1, 1], [], []>} : vector<8x16xf32>, vector<16x128xf32>, vector<8x128xf32> -> vector<8x128xf32>
    %cst_33 = arith.constant dense<0.000000e+00> : vector<8x128xf32>
    %57 = tpu.matmul %3, %18, %cst_33 {dimension_numbers = #tpu.dot_dimension_numbers<[1], [0], [0], [1], [0, 0, 1, 1], [], []>} : vector<8x16xf32>, vector<16x128xf32>, vector<8x128xf32> -> vector<8x128xf32>
    %58 = vector.broadcast %54 : vector<8x1xf32> to vector<8x128xf32>
    %59 = arith.mulf %56, %58 : vector<8x128xf32>
    %60 = vector.broadcast %55 : vector<8x1xf32> to vector<8x128xf32>
    %61 = arith.addf %59, %60 : vector<8x128xf32>
    %62 = arith.mulf %24, %61 : vector<8x128xf32>
    %63 = vector.broadcast %43 : vector<8x1xf32> to vector<8x128xf32>
    %64 = arith.mulf %57, %63 : vector<8x128xf32>
    %65 = vector.broadcast %53 : vector<8x1xf32> to vector<8x128xf32>
    %66 = arith.addf %64, %65 : vector<8x128xf32>
    %67 = arith.addf %62, %66 : vector<8x128xf32>
    %68 = arith.index_cast %c0_i32 : i32 to index
    %c0_34 = arith.constant 0 : index
    %c0_35 = arith.constant 0 : index
    %69 = vector.load %arg6[%68, %c0_34, %c0_35] : memref<1x8x128xf32, #tpu.memory_space<vmem>>, vector<1x8x128xf32>
    %70 = vector.shape_cast %69 : vector<1x8x128xf32> to vector<8x128xf32>
    %71 = vector.shape_cast %67 : vector<8x128xf32> to vector<1x8x128xf32>
    tpu.vector_store %arg6[%68, %c0_34, %c0_35], %71 {strides = array<i32>} : memref<1x8x128xf32, #tpu.memory_space<vmem>>, vector<1x8x128xf32>,
    %c1_i32 = arith.constant 1 : i32
    return
  }
  func.func @transform_0(%arg0: i32) -> (i32, i32, i32) {
    %c0_i32 = arith.constant 0 : i32
    %c0_i32_0 = arith.constant 0 : i32
    %c0_i32_1 = arith.constant 0 : i32
    return %arg0, %c0_i32, %c0_i32_0 : i32, i32, i32
  }
  func.func @transform_1(%arg0: i32) -> (i32, i32, i32) {
    %c0_i32 = arith.constant 0 : i32
    %c0_i32_0 = arith.constant 0 : i32
    %c0_i32_1 = arith.constant 0 : i32
    return %arg0, %c0_i32, %c0_i32_0 : i32, i32, i32
  }
  func.func @transform_2(%arg0: i32) -> (i32, i32, i32) {
    %c0_i32 = arith.constant 0 : i32
    %c0_i32_0 = arith.constant 0 : i32
    %c0_i32_1 = arith.constant 0 : i32
    %c0_i32_2 = arith.constant 0 : i32
    return %c0_i32, %c0_i32_0, %c0_i32_1 : i32, i32, i32
  }
  func.func @transform_3(%arg0: i32) -> (i32, i32) {
    %c0_i32 = arith.constant 0 : i32
    %c0_i32_0 = arith.constant 0 : i32
    %c0_i32_1 = arith.constant 0 : i32
    return %c0_i32, %c0_i32_0 : i32, i32
  }
  func.func @transform_4(%arg0: i32) -> (i32, i32, i32) {
    %c0_i32 = arith.constant 0 : i32
    %c0_i32_0 = arith.constant 0 : i32
    %c0_i32_1 = arith.constant 0 : i32
    %c0_i32_2 = arith.constant 0 : i32
    return %c0_i32, %c0_i32_0, %c0_i32_1 : i32, i32, i32
  }
  func.func @transform_5(%arg0: i32) -> (i32, i32, i32) {
    %c0_i32 = arith.constant 0 : i32
    %c0_i32_0 = arith.constant 0 : i32
    %c0_i32_1 = arith.constant 0 : i32
    return %arg0, %c0_i32, %c0_i32_0 : i32, i32, i32
  }
}

</mosaic_0001>

<bundles_post_ra>
// kernel: elain_forward.1
= control target key start
LH: loop header
LB: loop body
LE: loop exit
PB: predicated region body
PF: predicated region fallthrough
CT: control target
= control target key end

     0   :  { %10 = vsyncpa [#allocation3], 0  ;;  %s1270_s0 = inlined_call_operand.hbm [shape: f32[2,8,128], index: 0, kind: input, shape index: {}]   ;;  %s1271_s1 = inlined_call_operand.hbm [shape: f32[2,16,128], index: 1, kind: input, shape index: {}]   ;;  %s1272_s2 = inlined_call_operand.vmem [shape: f32[3,8,16], index: 2, kind: input, shape index: {}]   ;;  %s1273_s3 = inlined_call_operand.vmem [shape: f32[8,8], index: 3, kind: input, shape index: {}]   ;;  %s1274_s4 = inlined_call_operand.vmem [shape: f32[3,8,1], index: 4, kind: input, shape index: {}]   ;;  %s1275_s5 = inlined_call_operand.hbm [shape: f32[2,8,128], index: 5, kind: output, shape index: {}]  }
   0x1   :  { %12 = vsyncpa [#allocation3 + $0x1], 0 }
   0x2   :  { %13 = vsyncpa [#allocation6], 0 }
   0x3   :  { %15 = vsyncpa [#allocation6 + $0x1], 0 }
   0x4   :  { %16 = vsyncpa [#allocation4], 0 }
   0x5   :  { %18 = vsyncpa [#allocation4 + $0x1], 0  ;;  %s1036_s18 = smov 0   ;;  %s1038_s19 = smov 0  }
   0x6   :  { %s1040_s20 = smov 0   ;;  %s1042_s21 = smov 0  }
   0x7 LB: > { %s1057_s22 = sadd.s32 4294967295, %s996_s21   ;;  %s750_s23 = sadd.s32 4294967294, %s996_s21   ;;  %s996_s21 = sphi %s1042_s21, %s1293_s21   ;;  %s992_s20 = sphi %s1040_s20, %s1292_s20   ;;  %s988_s19 = sphi %s1038_s19, %s1291_s19   ;;  %s984_s18 = sphi %s1036_s18, %s1290_s18  }
   0x8   : > { %s1061_s24 = sadd.s32 1, %s996_s21   ;;  %s31_s25 = sadd.s32 1, %s992_s20 }
   0x9   : > { %s28_s26 = ssub.s32 %s996_s21, %s1061_s24  ;;  %p38_p0 = scmp.ne.s32.totalorder %s992_s20, %s988_s19 }
   0xa   : > { %p29_p1 = scmp.eq.s32.totalorder %s28_s26, 0  ;;  %p39_p2 = scmp.eq.s32.totalorder %s996_s21, 0 }
   0xb   : > { %p44_p3 = scmp.ne.s32.totalorder %s988_s19, %s984_s18  ;;  %p45_p4 = scmp.eq.s32.totalorder %s1057_s22, 0 }
   0xc   : > { %s1073_s27 = scalar_select %p29_p1, %s992_s20, %s31_s25  }
   0xd   : > { %p1075_p5 = por %p39_p2, %p38_p0  ;;  %p1079_p6 = por %p45_p4, %p44_p3 }
   0xe   : > { %p157_p7 = scmp.eq.s32.totalorder %s1057_s22, 1  ;;  %p163_p8 = scmp.eq.s32.totalorder %s750_s23, 1 }
   0xf   : > { %s1279_s29 = scalar_select %p1079_p6, 1, 0 }
  0x10   : > { %p829_p10 = scmp.lt.s32.totalorder %s996_s21, 2  ;;  %p1086_p11 = por %p157_p7, %p38_p0 }
  0x11   : > { %p1090_p12 = por %p163_p8, %p44_p3  ;;  %s1095_s7 = sand.u32 1, %s992_s20  }
  0x12   : > { %s1280_s30 = scalar_select %p1086_p11, 1, 0 }
  0x13   : > { %s1281_s6 = scalar_select %p1090_p12, 1, 0 }
  0x14   : > { %s754_s8 = sshll.u32 %s996_s21, 7  ;;  %s753_s9 = sshll.u32 %s1095_s7, 3 }
  0x15   : > { %s1102_s12 = scalar_lea.hbm %s1270_s0, %s754_s8  ;;  %s196_s13 = scalar_lea.vmem [#allocation2], %s753_s9 }
  0x16   : > { %s203_s14 = sshll.u32 %s196_s13, 4  ;;  %p1106_p13 = pnand %p829_p10, %p1075_p5  ;;  %s1110_s14 = int_to_ptr.vmem [resolvable:$true] %s203_s14 }
  0x17   : > { %s193_s16 = scalar_lea.sflag [#allocation3], %s1095_s7  ;;  %s872_s17 = scalar_lea.hbm %s1102_s12, 128 }
  0x18   : > { %p873_p2 = scmp.ne.s32.totalorder %s1102_s12, %s872_s17  ;;  %p874_p3 = pneg %p1106_p13 }
  0x19   : > { %s877_s26 = scalar_lea.hbm %s1270_s0, 256  ;;  %p878_p5 = scmp.lt.s32.totalorder %s1102_s12, %s1270_s0 }
  0x1a   : > { %p875_p4 = pnand %p874_p3, %p873_p2  ;;  %p879_p8 = scmp.lt.s32.totalorder %s877_s26, %s872_s17 }
  0x1c   : > { %p876_p7 = pneg %p875_p4  ;;  %p880_p10 = por %p879_p8, %p878_p5 }
  0x1e   : > { %p881_p9 = pnand %p880_p10, %p876_p7 }
  0x20   : > { %884 = shalt.err (!%p881_p9)
}
  0x21   : > { %s885_s9 = scalar_lea.vmem %s1110_s14, 128  ;;  %s998_s10 = smov [#allocation2]  }
  0x22   : > { %p886_p0 = scmp.ne.s32.totalorder %s1110_s14, %s885_s9  ;;  %s890_s11 = sshll.u32 %s998_s10, 4  ;;  %s891_s11 = int_to_ptr.vmem [resolvable:$false] %s890_s11 }
  0x23   : > { %s892_s13 = scalar_lea.vmem %s891_s11, 256  ;;  %p893_p1 = scmp.lt.s32.totalorder %s1110_s14, %s891_s11 }
  0x24   : > { %p888_p2 = pnand %p886_p0, %p874_p3  ;;  %p894_p12 = scmp.lt.s32.totalorder %s892_s13, %s885_s9 }
  0x26   : > { %p889_p4 = pneg %p888_p2  ;;  %p895_p11 = por %p894_p12, %p893_p1 }
  0x28   : > { %p896_p5 = pnand %p895_p11, %p889_p4 }
  0x2a   : > { %899 = shalt.err (!%p896_p5)
}
  0x2b   : > { %821 = dma.hbm_to_vmem [thread:$0]  (!%p1106_p13), %s1102_s12, 128, %s1110_s14, %s193_s16  }
  0x2c   : > { %p1283_p9 = scmp.lt.s32.totalorder %s996_s21, 3  ;;  %p1284_p0 = scmp.ge.s32.totalorder %s996_s21, 1 }
  0x2d   : > { %s755_s23 = sshll.u32 %s1095_s7, 4  ;;  %s774_s25 = sshll.u32 %s996_s21, 8 }
  0x2e   : > { %p1143_p7 = pnand %p1284_p0, %p1283_p9  ;;  %s1152_s8 = scalar_lea.hbm %s1271_s1, %s774_s25 }
  0x2f   : > { %s214_s9 = scalar_lea.vmem [#allocation5], %s755_s23  ;;  %s211_s12 = scalar_lea.sflag [#allocation6], %s1095_s7 }
  0x30   : > { %s221_s10 = sshll.u32 %s214_s9, 4  ;;  %s900_s14 = scalar_lea.hbm %s1152_s8, 256  ;;  %s1154_s10 = int_to_ptr.vmem [resolvable:$true] %s221_s10 }
  0x31   : > { %p901_p11 = scmp.ne.s32.totalorder %s1152_s8, %s900_s14  ;;  %s905_s13 = scalar_lea.hbm %s1271_s1, 512 }
  0x32   : > { %p906_p8 = scmp.lt.s32.totalorder %s1152_s8, %s1271_s1  ;;  %p907_p10 = scmp.lt.s32.totalorder %s905_s13, %s900_s14 }
  0x33   : > { %p903_p12 = pnand %p901_p11, %p874_p3 }
  0x34   : > { %p908_p2 = por %p907_p10, %p906_p8 }
  0x35   : > { %p904_p1 = pneg %p903_p12 }
  0x37   : > { %p909_p4 = pnand %p908_p2, %p904_p1 }
  0x39   : > { %912 = shalt.err (!%p909_p4)
}
  0x3a   : > { %s913_s23 = scalar_lea.vmem %s1154_s10, 256  ;;  %s999_s28 = smov [#allocation5]  }
  0x3b   : > { %p914_p5 = scmp.ne.s32.totalorder %s1154_s10, %s913_s23  ;;  %s918_s9 = sshll.u32 %s999_s28, 4  ;;  %s919_s9 = int_to_ptr.vmem [resolvable:$false] %s918_s9 }
  0x3c   : > { %s920_s16 = scalar_lea.vmem %s919_s9, 512  ;;  %p921_p11 = scmp.lt.s32.totalorder %s1154_s10, %s919_s9 }
  0x3d   : > { %p916_p9 = pnand %p914_p5, %p874_p3  ;;  %p922_p12 = scmp.lt.s32.totalorder %s920_s16, %s913_s23 }
  0x3f   : > { %p917_p0 = pneg %p916_p9  ;;  %p923_p6 = por %p922_p12, %p921_p11 }
  0x41   : > { %p924_p8 = pnand %p923_p6, %p917_p0 }
  0x43   : > { %927 = shalt.err (!%p924_p8)
}
  0x44   : > { %s1000_s14 = smov 128   ;;  %s1001_s11 = smov 8  }
  0x45   : > { %824 = dma.hbm_to_vmem [thread:$0]  (!%p1106_p13), %s1152_s8, 256, %s1154_s10, %s211_s12, %s1000_s14, %s1000_s14, %s1001_s11  }
  0x46   : > { %233 = sbr.rel (%p1143_p7) target bundleno = 577 (0x241), region = 40  ;;  %s1184_s13 = sand.u32 (!%p1143_p7), 1, %s988_s19  }
  0x47   : > { %s759_s25 = sshll.u32 (!%p1143_p7), %s1184_s13, 3  ;;  %s236_s26 = scalar_lea.sflag (!%p1143_p7), [#allocation3], %s1184_s13 }
  0x48   : > { %s239_s23 = scalar_lea.vmem (!%p1143_p7), [#allocation2], %s759_s25  ;;  %p1286_p6 = scmp.ne.s32.totalorder (!%p1143_p7), %s1279_s29, 0 }
  0x4b   : > { %971 = dma.done.wait (%p1286_p6), %s236_s26, 128  }
  0x4c   : > { %973 = vsyncadd (%p1286_p6), %s236_s26, 4294967168  ;;  %s760_s7 = sshll.u32 %s1184_s13, 4  ;;  %s245_s15 = scalar_lea.sflag [#allocation6], %s1184_s13 }
  0x4d   : > { %s248_s17 = scalar_lea.vmem [#allocation5], %s760_s7 }
  0x4e   : > { %975 = dma.done.wait (%p1286_p6), %s245_s15, 256  }
  0x4f   : > { %977 = vsyncadd (%p1286_p6), %s245_s15, 4294967040  ;;  %v293_v0 = vld [vmem:[%s248_s17 + $0x8] sm:$0xff]  ;;  %v292_v1 = vld [vmem:[%s248_s17] sm:$0xff]  ;;  %v1002_v3 = vmov 0.0   ;;  %vm1003_vm0 = vmmov 0   ;;  %vm385_vm1 = vcmask 130048  }
  0x50   : > { %307 = vadd.xlane.f32.xlu0 %v293_v0  ;;  %305 = vadd.xlane.f32.xlu1 %v292_v1  ;;  %v291_v2 = vld [vmem:[%s239_s23] sm:$0xff]  ;;  %v763_v8 = vld [vmem:[%s1272_s2 + $0x10] sm:$0xff]  ;;  %vm311_vm2 = vcmask 64512   ;;  %v1004_v16 = vmov 0   ;;  %s771_s29 = sshll.u32 %s1057_s22, 7  ;;  %s279_s8 = scalar_lea.vmem [#allocation7], %s759_s25 }
  0x51   : > { %791 = vmatprep.subr.mxu1 %v1002_v3  ;;  %786 = vmatprep.subr.mxu0 %v1002_v3  ;;  %v285_v11 = vld [vmem:[%s1273_s3] sm:$0xff]  ;;  %v762_v14 = vld [vmem:[%s1272_s2 + $0x8] sm:$0xff]  ;;  %v765_v21 = vld [vmem:[%s1274_s4 + $0x10] sm:$0xff]  ;;  %s657_s10 = sshll.u32 %s279_s8, 4  ;;  %s655_s9 = scalar_lea.hbm %s1275_s5, %s771_s29  ;;  %s658_s10 = int_to_ptr.vmem [resolvable:$true] %s657_s10 }
  0x52   : > { %795 = vmatprep.mubr.msk.f32.mxu1 %vm1003_vm0, %v1002_v3  ;;  %788 = vmatprep.mubr.msk.f32.mxu0 %vm1003_vm0, %v1002_v3  ;;  %v280_v15 = vld [vmem:[%s1272_s2] sm:$0xff]  ;;  %v764_v40 = vld [vmem:[%s1274_s4 + $0x8] sm:$0xff]  ;;  %s644_s16 = scalar_lea.sflag [#allocation4], %s1184_s13  ;;  %s928_s14 = scalar_lea.vmem %s658_s10, 128 }
  0x53   : > { %869 = vset.pattern.permute.xlu1 %v1004_v16  ;;  %868 = vset.pattern.permute.xlu0 %v1004_v16  ;;  %v286_v28 = vld [vmem:[%s1274_s4] sm:$0xff]  ;;  %p929_p13 = scmp.ne.s32.totalorder %s658_s10, %s928_s14  ;;  %p1287_p3 = scmp.ne.s32.totalorder %s1280_s30, 0 }
  0x54   : > { %294 = vadd.xlane.f32.xlu0 %v291_v2  ;;  %s1005_s22 = smov [#allocation7]  }
  0x55   : > { %p930_p7 = pnand %p929_p13, %p1287_p3  ;;  %s932_s11 = sshll.u32 %s1005_s22, 4  ;;  %s933_s11 = int_to_ptr.vmem [resolvable:$false] %s932_s11 }
  0x56   : > { %s934_s25 = scalar_lea.vmem %s933_s11, 256  ;;  %p935_p10 = scmp.lt.s32.totalorder %s658_s10, %s933_s11 }
  0x57   : > { %p931_p1 = pneg %p930_p7  ;;  %p936_p2 = scmp.lt.s32.totalorder %s934_s25, %s928_s14 }
  0x59   : > { %p937_p4 = por %p936_p2, %p935_p10 }
  0x5b   : > { %p938_p5 = pnand %p937_p4, %p931_p1 }
  0xd9   : > { %v308_v4 = vpop.xlane.xlu0 %307  ;;  %v306_v5 = vpop.xlane.xlu1 %305 }
  0xda   : > { %v310_v6 = vmul.f32 0.0078125, %v308_v4  ;;  %v309_v7 = vmul.f32 0.0078125, %v306_v5 }
  0xdc   : > { %792 = vmatpush3.msra.mxu1 %v310_v6 }
  0xdd   : > { %793 = vmatprep.subr.mxu1 %v1002_v3  ;;  %v295_v9 = vpop.xlane.xlu0 %294 }
  0xde   : > { %v296_v10 = vmul.f32 0.0078125, %v295_v9  ;;  %794 = vmatpush3.msra.mxu1 %v309_v7 }
  0xdf   : > { %796 = vmatmul.mubr.msk.f32.vlgmr.msra.gmra.mxu1 %vm385_vm1, %v763_v8  ;;  %805 = vmatprep.subr.mxu1 %v1002_v3 }
  0xe0   : > { %787 = vmatpush3.msra.mxu0 %v296_v10  ;;  %v1209_v12 = vsub.f32 %v291_v2, %v296_v10  ;;  %806 = vmatpush3.msra.mxu1 %v293_v0 }
  0xe1   : > { %789 = vmatmul.mubr.msk.f32.vlgmr.msra.gmra.mxu0 %vm311_vm2, %v285_v11  ;;  %798 = vmatprep.subr.mxu0 %v1002_v3 }
  0xe2   : > { %v298_v13 = vmul.f32 %v1209_v12, %v1209_v12  ;;  %807 = vmatprep.subr.mxu1 %v1002_v3  ;;  %799 = vmatpush3.msra.mxu0 %v293_v0 }
  0xe3   : > { %808 = vmatpush3.msra.mxu1 %v292_v1  ;;  %809 = vmatprep.mubr.msk.f32.mxu1 %vm1003_vm0, %v1002_v3 }
  0xe4   : > { %299 = vadd.xlane.f32.xlu1 %v298_v13  ;;  %800 = vmatprep.subr.mxu0 %v1002_v3 }
  0xe5   : > { %810 = vmatmul.mubr.msk.f32.vlgmr.msra.gmra.mxu1 %vm385_vm1, %v762_v14  ;;  %801 = vmatpush3.msra.mxu0 %v292_v1 }
  0xe6   : > { %802 = vmatprep.mubr.msk.f32.mxu0 %vm1003_vm0, %v1002_v3 }
  0xe7   : > { %803 = vmatmul.mubr.msk.f32.vlgmr.msra.gmra.mxu0 %vm385_vm1, %v280_v15 }
 0x16d   : > { %v300_v17 = vpop.xlane.xlu1 %299 }
 0x16e   : > { %v301_v18 = vmul.f32 0.007874016, %v300_v17 }
 0x170   : > { %v302_v19 = vadd.f32 1e-05, %v301_v18 }
 0x172   : > { %870 = vrsqrt.f32 %v302_v19 }
 0x17f   : > { %v871_v25 = vpop.eup %870 }
 0x180   : > { %v304_v30 = vmul.f32 %v871_v25, %v302_v19 }
 0x19f   : > { %v455_v20 = vpop.f32.mrf.mxu1 }
 0x1a1   : > { %v381_v22 = vpop.f32.mrf.mxu0  ;;  %v797_v23 = vpop.f32.mrf.mxu1 }
 0x1a2   : > { %v456_v24 = vadd.f32 %v455_v20, %v381_v22 }
 0x1a3   : > { %v790_v26 = vpop.f32.mrf.mxu0 }
 0x1a4   : > { %v459_v27 = vadd.f32 %v765_v21, %v456_v24 }
 0x1a5   : > { %v612_v29 = vpop.f32.mrf.mxu1 }
 0x1a6   : > { %631 = vperm.xlu1 %869, %v459_v27   ;;  %v468_v31 = vmul.f32 %v871_v25, %v459_v27  ;;  %v460_v32 = vsub.f32 1.0, %v459_v27  ;;  %v461_v35 = vmul.f32 %v459_v27, %v286_v28  ;;  %v465_v43 = vmul.f32 %v764_v40, %v459_v27 }
 0x1a7   : > { %v539_v33 = vpop.f32.mrf.mxu0  ;;  %v811_v34 = vpop.f32.mrf.mxu1 }
 0x1a8   : > { %618 = vperm.xlu0 %868, %v468_v31   ;;  %v462_v36 = vmul.f32 %v460_v32, %v304_v30  ;;  %v466_v42 = vmul.f32 %v460_v32, %v296_v10 }
 0x1a9   : > { %v804_v37 = vpop.f32.mrf.mxu0 }
 0x1aa   : > { %v463_v38 = vadd.f32 %v462_v36, %v461_v35  ;;  %v467_v44 = vadd.f32 %v466_v42, %v465_v43 }
 0x1ac   : > { %v464_v39 = vadd.f32 1.0, %v463_v38 }
 0x1ae   : > { %v469_v41 = vmul.f32 %v871_v25, %v464_v39 }
 0x1b0   : > { %624 = vperm.xlu1 %869, %v469_v41  }
 0x1b4   : > { %637 = vperm.xlu1 %869, %v467_v44  }
 0x221   : > { %v632_v45 = vpop.permute.xlu1 %631 }
 0x222   : > { %v634_v50 = vmul.f32 %v632_v45, %v612_v29 }
 0x223   : > { %v619_v46 = vpop.permute.xlu0 %618 }
 0x224   : > { %v621_v47 = vmul.f32 %v619_v46, %v539_v33 }
 0x22b   : > { %v625_v48 = vpop.permute.xlu1 %624 }
 0x22c   : > { %v627_v49 = vadd.f32 %v625_v48, %v621_v47 }
 0x22e   : > { %v628_v52 = vmul.f32 %v627_v49, %v1209_v12 }
 0x22f   : > { %v638_v51 = vpop.permute.xlu1 %637 }
 0x230   : > { %v640_v53 = vadd.f32 %v638_v51, %v634_v50 }
 0x232   : > { %v641_v54 = vadd.f32 %v640_v53, %v628_v52 }
 0x234   : > { %642 = vst [vmem:[%s279_s8] sm:$0xff] %v641_v54 }
 0x235   : > { %941 = shalt.err (!%p938_p5)
}
 0x236   : > { %s942_s26 = scalar_lea.hbm %s655_s9, 128  ;;  %s946_s7 = scalar_lea.hbm %s1275_s5, 256 }
 0x237   : > { %p943_p9 = scmp.ne.s32.totalorder %s655_s9, %s942_s26  ;;  %p947_p12 = scmp.lt.s32.totalorder %s655_s9, %s1275_s5 }
 0x238   : > { %p948_p8 = scmp.lt.s32.totalorder %s946_s7, %s942_s26 }
 0x239   : > { %p944_p0 = pnand %p943_p9, %p1287_p3 }
 0x23a   : > { %p949_p6 = por %p948_p8, %p947_p12 }
 0x23b   : > { %p945_p11 = pneg %p944_p0 }
 0x23d   : > { %p950_p13 = pnand %p949_p6, %p945_p11 }
 0x23f   : > { %953 = shalt.err (!%p950_p13)
}
 0x240   : > { %816 = dma.vmem_to_hbm [thread:$0]  (%p1287_p3), %s658_s10, 128, %s655_s9, %s644_s16  }
 0x241 PF: > { %s669_s29 = sand.u32 1, %s984_s18   ;;  %p1288_p7 = scmp.ne.s32.totalorder %s1281_s6, 0 }
 0x242   : > { %p1289_p1 = scmp.ge.s32.totalorder %s996_s21, 2  ;;  %s670_s8 = scalar_lea.sflag [#allocation4], %s669_s29 }
 0x244   : > { %p826_p10 = pnand %p1289_p1, %p1288_p7 }
 0x246   : > { %p827_p2 = pneg %p826_p10 }
 0x248   : > { %979 = dma.done.wait (%p827_p2), %s670_s8, 128  }
 0x249   : > { %981 = vsyncadd (%p827_p2), %s670_s8, 4294967168  ;;  %p21_p4 = scmp.ge.s32.totalorder %s1061_s24, 4   ;;  %s1290_s18 = smov %s988_s19 }
 0x24a   : > { %s1291_s19 = smov %s992_s20  ;;  %s1292_s20 = smov %s1073_s27 }
 0x24b   : > { %s1293_s21 = smov %s1061_s24  ;;  %23 = sbr.rel (!%p21_p4) target bundleno = 7 (0x7), region = 102 }
 0x250   :  { %675 = vsyncpa [#allocation3], 1 }
 0x251   :  { %677 = vsyncpa [#allocation3 + $0x1], 1 }
 0x252   :  { %678 = vsyncpa [#allocation6], 1 }
 0x253   :  { %680 = vsyncpa [#allocation6 + $0x1], 1 }
 0x254   :  { %681 = vsyncpa [#allocation4], 1 }
 0x255   :  { %683 = vsyncpa [#allocation4 + $0x1], 1 }

</bundles_post_ra>
